<compile_context>
chip_gen: v7x
topology: tpu7x:2x2x1
jax: 0.10.0
libtpu: 0.0.40
codegen_flags: <defaults>
</compile_context>

<pallas_src>
import functools

import jax
import jax.numpy as jnp
from jax.experimental import pallas as pl
from jax.experimental.pallas import tpu as pltpu


OUT_PAD = 8            # final layer padded 7 -> 8 output columns
NEG_PAD = -1e30        # finite "minus infinity" for the padded logit column


def _round_up(n, m):
    return ((n + m - 1) // m) * m


def mlp_logsoftmax_kernel(x_ref,
                          w1_ref, b1_ref,
                          w2_ref, b2_ref,
                          w3_ref, b3_ref,
                          w4_ref, b4_ref,
                          o_ref):
    # bf16 operands for the MXU; accumulation and all element-wise math in f32.
    x = x_ref[...].astype(jnp.bfloat16)

    # Linear(11 -> 128) + ReLU
    h = jnp.dot(x, w1_ref[...], preferred_element_type=jnp.float32) + b1_ref[...]
    h = jnp.maximum(h, 0.0)

    # Linear(128 -> 64) + ReLU
    h = jnp.dot(h.astype(jnp.bfloat16), w2_ref[...],
                preferred_element_type=jnp.float32) + b2_ref[...]
    h = jnp.maximum(h, 0.0)

    # Linear(64 -> 32) + ReLU
    h = jnp.dot(h.astype(jnp.bfloat16), w3_ref[...],
                preferred_element_type=jnp.float32) + b3_ref[...]
    h = jnp.maximum(h, 0.0)

    # Linear(32 -> 8): real 7 logits + one padded column whose bias is -1e30,
    # so exp(pad - max) == 0 and it never affects the log_softmax of the real
    # columns (and never produces inf/NaN).
    logits = jnp.dot(h.astype(jnp.bfloat16), w4_ref[...],
                     preferred_element_type=jnp.float32) + b4_ref[...]

    # Numerically stable log_softmax over dim=1.
    m = jnp.max(logits, axis=1, keepdims=True)
    shifted = logits - m
    lse = jnp.log(jnp.sum(jnp.exp(shifted), axis=1, keepdims=True))
    o_ref[...] = shifted - lse


@functools.partial(jax.jit, static_argnames=("tb",))
def model_forward(x, params, tb=2048):
    """Forward pass of the wine MLP. x: (B, 11) f32 -> (B, 7) f32 log-probs."""
    (w1, b1), (w2, b2), (w3, b3), (w4, b4) = params
    B, f_in = x.shape
    f_out = w4.shape[1]

    # Pad the output layer 7 -> 8 columns: zero weights, -1e30 bias for the
    # padded column.  (Tiny; hoistable out of the jit if params are static.)
    w4p = jnp.zeros((w4.shape[0], OUT_PAD), jnp.float32).at[:, :f_out].set(w4)
    b4p = jnp.full((1, OUT_PAD), NEG_PAD, jnp.float32).at[:, :f_out].set(b4)

    # bf16 weights for the MXU; biases stay f32 (bias add / softmax run f32).
    w1b, w2b, w3b, w4b = (w.astype(jnp.bfloat16) for w in (w1, w2, w3, w4p))

    # Batch tile: multiple of 8 sublanes, capped so that (a) it never exceeds
    # `tb` and (b) medium batches get at least 2 grid steps, letting the
    # "parallel" batch axis shard across both v7x TensorCores.
    TB = max(8, min(tb, _round_up(-(-B // 2), 8)))
    grid = (pl.cdiv(B, TB),)
    # No explicit batch padding: the ragged tail block is masked by Pallas,
    # and every output row depends only on its own input row.

    def row_spec(shape):
        return pl.BlockSpec(shape, lambda i: (i, 0))

    def resident_spec(shape):
        # Constant index_map -> block stays VMEM-resident across grid steps.
        return pl.BlockSpec(shape, lambda i: (0, 0))

    out = pl.pallas_call(
        mlp_logsoftmax_kernel,
        out_shape=jax.ShapeDtypeStruct((B, OUT_PAD), jnp.float32),
        grid=grid,
        in_specs=[
            row_spec((TB, f_in)),
            resident_spec(w1b.shape), resident_spec(b1.shape),
            resident_spec(w2b.shape), resident_spec(b2.shape),
            resident_spec(w3b.shape), resident_spec(b3.shape),
            resident_spec(w4b.shape), resident_spec(b4p.shape),
        ],
        out_specs=row_spec((TB, OUT_PAD)),
        compiler_params=pltpu.CompilerParams(
            dimension_semantics=("parallel",),
            vmem_limit_bytes=48 * 1024 * 1024),
    )(x, w1b, b1, w2b, b2, w3b, b3, w4b, b4p)

    # Drop the single padded logit column.
    return out[:, :f_out]


def init_linear(key, fan_in, fan_out):
    # Deterministic init mimicking torch's uniform(-1/sqrt(fan_in), 1/sqrt(fan_in)).
    kw, kb = jax.random.split(key)
    bound = 1.0 / jnp.sqrt(jnp.float32(fan_in))
    # Stored as (in_features, out_features) — transpose of torch's weight.
    w = jax.random.uniform(kw, (fan_in, fan_out), jnp.float32, -bound, bound)
    b = jax.random.uniform(kb, (1, fan_out), jnp.float32, -bound, bound)
    return w, b


def make_params(key, f_input=11, f_output=7):
    k1, k2, k3, k4 = jax.random.split(key, 4)
    return (
        init_linear(k1, f_input, 128),
        init_linear(k2, 128, 64),
        init_linear(k3, 64, 32),
        init_linear(k4, 32, f_output),
    )


def reference_forward(x, params):
    (w1, b1), (w2, b2), (w3, b3), (w4, b4) = params
    h = jnp.maximum(x @ w1 + b1, 0.0)
    h = jnp.maximum(h @ w2 + b2, 0.0)
    h = jnp.maximum(h @ w3 + b3, 0.0)
    return jax.nn.log_softmax(h @ w4 + b4, axis=1)


if __name__ == "__main__":
    key = jax.random.PRNGKey(0)
    kx, kp, kx2 = jax.random.split(key, 3)

    f_input, f_output = 11, 7
    params = make_params(kp, f_input=f_input, f_output=f_output)

    # Small batch (single grid step).
    batch = 8
    x = jax.random.normal(kx, (batch, f_input), jnp.float32)
    out = jax.block_until_ready(model_forward(x, params))
    ref = reference_forward(x, params)
    assert out.shape == (batch, f_output)
    # bf16 MXU operands -> compare against the pure-f32 reference loosely.
    assert jnp.allclose(out, ref, atol=3e-2, rtol=3e-2), \
        float(jnp.max(jnp.abs(out - ref)))

    # Ragged multi-step batch with a small tile: exercises the cdiv grid, the
    # masked tail block and the parallel batch axis.
    batch2 = 300
    x2 = jax.random.normal(kx2, (batch2, f_input), jnp.float32)
    out2 = jax.block_until_ready(model_forward(x2, params, tb=128))
    ref2 = reference_forward(x2, params)
    assert out2.shape == (batch2, f_output)
    assert jnp.allclose(out2, ref2, atol=3e-2, rtol=3e-2), \
        float(jnp.max(jnp.abs(out2 - ref2)))

    print("KERNEL_OK")
</pallas_src>

<mosaic_0001>
module attributes {stable_mosaic.version = 11 : i64} {
  func.func @mlp_logsoftmax_kernel(%arg0: i32, %arg1: memref<8x11xf32, #tpu.memory_space<vmem>>, %arg2: memref<11x128xbf16, #tpu.memory_space<vmem>>, %arg3: memref<1x128xf32, #tpu.memory_space<vmem>>, %arg4: memref<128x64xbf16, #tpu.memory_space<vmem>>, %arg5: memref<1x64xf32, #tpu.memory_space<vmem>>, %arg6: memref<64x32xbf16, #tpu.memory_space<vmem>>, %arg7: memref<1x32xf32, #tpu.memory_space<vmem>>, %arg8: memref<32x8xbf16, #tpu.memory_space<vmem>>, %arg9: memref<1x8xf32, #tpu.memory_space<vmem>>, %arg10: memref<8x8xf32, #tpu.memory_space<vmem>>) attributes {dimension_semantics = [#tpu.dimension_semantics<parallel>], iteration_bounds = array<i64: 1>, scalar_prefetch = 0 : i64, scratch_operands = 0 : i64, tpu.core_type = #tpu.core_type<tc>, window_params = [{transform_indices = @transform_0, window_bounds = array<i64: 8, 11>}, {pipeline_mode = #tpu.pipeline_mode<synchronous>, transform_indices = @transform_1, window_bounds = array<i64: 11, 128>}, {pipeline_mode = #tpu.pipeline_mode<synchronous>, transform_indices = @transform_2, window_bounds = array<i64: 1, 128>}, {pipeline_mode = #tpu.pipeline_mode<synchronous>, transform_indices = @transform_3, window_bounds = array<i64: 128, 64>}, {pipeline_mode = #tpu.pipeline_mode<synchronous>, transform_indices = @transform_4, window_bounds = array<i64: 1, 64>}, {pipeline_mode = #tpu.pipeline_mode<synchronous>, transform_indices = @transform_5, window_bounds = array<i64: 64, 32>}, {pipeline_mode = #tpu.pipeline_mode<synchronous>, transform_indices = @transform_6, window_bounds = array<i64: 1, 32>}, {pipeline_mode = #tpu.pipeline_mode<synchronous>, transform_indices = @transform_7, window_bounds = array<i64: 32, 8>}, {pipeline_mode = #tpu.pipeline_mode<synchronous>, transform_indices = @transform_8, window_bounds = array<i64: 1, 8>}, {transform_indices = @transform_9, window_bounds = array<i64: 8, 8>}]} {
    %c0 = arith.constant 0 : index
    %c0_0 = arith.constant 0 : index
    %0 = vector.load %arg1[%c0, %c0_0] : memref<8x11xf32, #tpu.memory_space<vmem>>, vector<8x11xf32>
    %1 = arith.truncf %0 : vector<8x11xf32> to vector<8x11xbf16>
    %c0_1 = arith.constant 0 : index
    %c0_2 = arith.constant 0 : index
    %2 = vector.load %arg2[%c0_1, %c0_2] : memref<11x128xbf16, #tpu.memory_space<vmem>>, vector<11x128xbf16>
    %cst = arith.constant dense<0.000000e+00> : vector<8x128xf32>
    %3 = tpu.matmul %1, %2, %cst {dimension_numbers = #tpu.dot_dimension_numbers<[1], [0], [0], [1], [0, 0, 1, 1], [], []>} : vector<8x11xbf16>, vector<11x128xbf16>, vector<8x128xf32> -> vector<8x128xf32>
    %c0_3 = arith.constant 0 : index
    %c0_4 = arith.constant 0 : index
    %4 = vector.load %arg3[%c0_3, %c0_4] : memref<1x128xf32, #tpu.memory_space<vmem>>, vector<1x128xf32>
    %5 = vector.broadcast %4 : vector<1x128xf32> to vector<8x128xf32>
    %6 = arith.addf %3, %5 : vector<8x128xf32>
    %cst_5 = arith.constant 0.000000e+00 : f32
    %7 = vector.broadcast %cst_5 : f32 to vector<8x128xf32>
    %8 = arith.maximumf %6, %7 : vector<8x128xf32>
    %9 = arith.truncf %8 : vector<8x128xf32> to vector<8x128xbf16>
    %c0_6 = arith.constant 0 : index
    %c0_7 = arith.constant 0 : index
    %10 = vector.load %arg4[%c0_6, %c0_7] : memref<128x64xbf16, #tpu.memory_space<vmem>>, vector<128x64xbf16>
    %cst_8 = arith.constant dense<0.000000e+00> : vector<8x64xf32>
    %11 = tpu.matmul %9, %10, %cst_8 {dimension_numbers = #tpu.dot_dimension_numbers<[1], [0], [0], [1], [0, 0, 1, 1], [], []>} : vector<8x128xbf16>, vector<128x64xbf16>, vector<8x64xf32> -> vector<8x64xf32>
    %c0_9 = arith.constant 0 : index
    %c0_10 = arith.constant 0 : index
    %12 = vector.load %arg5[%c0_9, %c0_10] : memref<1x64xf32, #tpu.memory_space<vmem>>, vector<1x64xf32>
    %13 = vector.broadcast %12 : vector<1x64xf32> to vector<8x64xf32>
    %14 = arith.addf %11, %13 : vector<8x64xf32>
    %cst_11 = arith.constant 0.000000e+00 : f32
    %15 = vector.broadcast %cst_11 : f32 to vector<8x64xf32>
    %16 = arith.maximumf %14, %15 : vector<8x64xf32>
    %17 = arith.truncf %16 : vector<8x64xf32> to vector<8x64xbf16>
    %c0_12 = arith.constant 0 : index
    %c0_13 = arith.constant 0 : index
    %18 = vector.load %arg6[%c0_12, %c0_13] : memref<64x32xbf16, #tpu.memory_space<vmem>>, vector<64x32xbf16>
    %cst_14 = arith.constant dense<0.000000e+00> : vector<8x32xf32>
    %19 = tpu.matmul %17, %18, %cst_14 {dimension_numbers = #tpu.dot_dimension_numbers<[1], [0], [0], [1], [0, 0, 1, 1], [], []>} : vector<8x64xbf16>, vector<64x32xbf16>, vector<8x32xf32> -> vector<8x32xf32>
    %c0_15 = arith.constant 0 : index
    %c0_16 = arith.constant 0 : index
    %20 = vector.load %arg7[%c0_15, %c0_16] : memref<1x32xf32, #tpu.memory_space<vmem>>, vector<1x32xf32>
    %21 = vector.broadcast %20 : vector<1x32xf32> to vector<8x32xf32>
    %22 = arith.addf %19, %21 : vector<8x32xf32>
    %cst_17 = arith.constant 0.000000e+00 : f32
    %23 = vector.broadcast %cst_17 : f32 to vector<8x32xf32>
    %24 = arith.maximumf %22, %23 : vector<8x32xf32>
    %25 = arith.truncf %24 : vector<8x32xf32> to vector<8x32xbf16>
    %c0_18 = arith.constant 0 : index
    %c0_19 = arith.constant 0 : index
    %26 = vector.load %arg8[%c0_18, %c0_19] : memref<32x8xbf16, #tpu.memory_space<vmem>>, vector<32x8xbf16>
    %cst_20 = arith.constant dense<0.000000e+00> : vector<8x8xf32>
    %27 = tpu.matmul %25, %26, %cst_20 {dimension_numbers = #tpu.dot_dimension_numbers<[1], [0], [0], [1], [0, 0, 1, 1], [], []>} : vector<8x32xbf16>, vector<32x8xbf16>, vector<8x8xf32> -> vector<8x8xf32>
    %c0_21 = arith.constant 0 : index
    %c0_22 = arith.constant 0 : index
    %28 = vector.load %arg9[%c0_21, %c0_22] : memref<1x8xf32, #tpu.memory_space<vmem>>, vector<1x8xf32>
    %29 = vector.broadcast %28 : vector<1x8xf32> to vector<8x8xf32>
    %30 = arith.addf %27, %29 : vector<8x8xf32>
    %cst_23 = arith.constant dense<0xFF800000> : vector<8xf32>
    %31 = vector.multi_reduction <maximumf>, %30, %cst_23 [1] : vector<8x8xf32> to vector<8xf32>
    %32 = vector.shape_cast %31 : vector<8xf32> to vector<8x1xf32>
    %33 = vector.broadcast %32 : vector<8x1xf32> to vector<8x8xf32>
    %34 = arith.subf %30, %33 : vector<8x8xf32>
    %35 = math.exp %34 : vector<8x8xf32>
    %cst_24 = arith.constant dense<0.000000e+00> : vector<8xf32>
    %36 = vector.multi_reduction <add>, %35, %cst_24 [1] : vector<8x8xf32> to vector<8xf32>
    %37 = vector.shape_cast %36 : vector<8xf32> to vector<8x1xf32>
    %38 = math.log %37 : vector<8x1xf32>
    %39 = vector.broadcast %38 : vector<8x1xf32> to vector<8x8xf32>
    %40 = arith.subf %34, %39 : vector<8x8xf32>
    %c0_25 = arith.constant 0 : index
    %c0_26 = arith.constant 0 : index
    %41 = vector.load %arg10[%c0_25, %c0_26] : memref<8x8xf32, #tpu.memory_space<vmem>>, vector<8x8xf32>
    tpu.vector_store %arg10[%c0_25, %c0_26], %40 {strides = array<i32>} : memref<8x8xf32, #tpu.memory_space<vmem>>, vector<8x8xf32>,
    return
  }
  func.func @transform_0(%arg0: i32) -> (i32, i32) {
    %c0_i32 = arith.constant 0 : i32
    %c0_i32_0 = arith.constant 0 : i32
    return %arg0, %c0_i32 : i32, i32
  }
  func.func @transform_1(%arg0: i32) -> (i32, i32) {
    %c0_i32 = arith.constant 0 : i32
    %c0_i32_0 = arith.constant 0 : i32
    %c0_i32_1 = arith.constant 0 : i32
    return %c0_i32, %c0_i32_0 : i32, i32
  }
  func.func @transform_2(%arg0: i32) -> (i32, i32) {
    %c0_i32 = arith.constant 0 : i32
    %c0_i32_0 = arith.constant 0 : i32
    %c0_i32_1 = arith.constant 0 : i32
    return %c0_i32, %c0_i32_0 : i32, i32
  }
  func.func @transform_3(%arg0: i32) -> (i32, i32) {
    %c0_i32 = arith.constant 0 : i32
    %c0_i32_0 = arith.constant 0 : i32
    %c0_i32_1 = arith.constant 0 : i32
    return %c0_i32, %c0_i32_0 : i32, i32
  }
  func.func @transform_4(%arg0: i32) -> (i32, i32) {
    %c0_i32 = arith.constant 0 : i32
    %c0_i32_0 = arith.constant 0 : i32
    %c0_i32_1 = arith.constant 0 : i32
    return %c0_i32, %c0_i32_0 : i32, i32
  }
  func.func @transform_5(%arg0: i32) -> (i32, i32) {
    %c0_i32 = arith.constant 0 : i32
    %c0_i32_0 = arith.constant 0 : i32
    %c0_i32_1 = arith.constant 0 : i32
    return %c0_i32, %c0_i32_0 : i32, i32
  }
  func.func @transform_6(%arg0: i32) -> (i32, i32) {
    %c0_i32 = arith.constant 0 : i32
    %c0_i32_0 = arith.constant 0 : i32
    %c0_i32_1 = arith.constant 0 : i32
    return %c0_i32, %c0_i32_0 : i32, i32
  }
  func.func @transform_7(%arg0: i32) -> (i32, i32) {
    %c0_i32 = arith.constant 0 : i32
    %c0_i32_0 = arith.constant 0 : i32
    %c0_i32_1 = arith.constant 0 : i32
    return %c0_i32, %c0_i32_0 : i32, i32
  }
  func.func @transform_8(%arg0: i32) -> (i32, i32) {
    %c0_i32 = arith.constant 0 : i32
    %c0_i32_0 = arith.constant 0 : i32
    %c0_i32_1 = arith.constant 0 : i32
    return %c0_i32, %c0_i32_0 : i32, i32
  }
  func.func @transform_9(%arg0: i32) -> (i32, i32) {
    %c0_i32 = arith.constant 0 : i32
    %c0_i32_0 = arith.constant 0 : i32
    return %arg0, %c0_i32 : i32, i32
  }
}

</mosaic_0001>

<bundles_post_ra>
// kernel: model_forward.1
= control target key start
LH: loop header
LB: loop body
LE: loop exit
PB: predicated region body
PF: predicated region fallthrough
CT: control target
= control target key end

     0   :  { %vm54_vm0 = vcmask 1044480   ;;  %v530_v0 = vmov 0.0   ;;  %vm55_vm1 = vcmask 1045504   ;;  %v531_v2 = vmov 65535   ;;  %s682_s0 = inlined_call_operand.vmem [shape: f32[8,11], index: 0, kind: input, shape index: {}]   ;;  %s683_s1 = inlined_call_operand.vmem [shape: bf16[11,128], index: 1, kind: input, shape index: {}]   ;;  %s684_s2 = inlined_call_operand.vmem [shape: f32[1,128], index: 2, kind: input, shape index: {}]   ;;  %s685_s3 = inlined_call_operand.vmem [shape: bf16[128,64], index: 3, kind: input, shape index: {}]   ;;  %s686_s4 = inlined_call_operand.vmem [shape: f32[1,64], index: 4, kind: input, shape index: {}]   ;;  %s687_s5 = inlined_call_operand.vmem [shape: bf16[64,32], index: 5, kind: input, shape index: {}]   ;;  %s688_s6 = inlined_call_operand.vmem [shape: f32[1,32], index: 6, kind: input, shape index: {}]   ;;  %s689_s7 = inlined_call_operand.vmem [shape: bf16[32,8], index: 7, kind: input, shape index: {}]   ;;  %s690_s8 = inlined_call_operand.vmem [shape: f32[1,8], index: 8, kind: input, shape index: {}]   ;;  %s691_s9 = inlined_call_operand.hbm [shape: f32[8,8], index: 9, kind: output, shape index: {}]  }
   0x1   :  { %437 = vmatprep.subr.bf16.mxu0 %v530_v0  ;;  %v487_v1 = vld [vmem:[%s683_s1] sm:$0x3f]   ;;  %443 = vmatprep.subr.bf16.mxu1 %v530_v0  ;;  %v56_v3 = vsel %vm54_vm0, 4294967295, %v531_v2  ;;  %vm532_vm2 = vmmov 0   ;;  %v489_v9 = vld [vmem:[%s685_s3 + $0x8] sm:$0xff]   ;;  %vm50_vm3 = vcmask 89088  }
   0x2   :  { %439 = vmatprep.mubr.msk.bf16.mxu0 %vm532_vm2, %v530_v0  ;;  %v34_v4 = vld [vmem:[%s682_s0] sm:$0xff]  ;;  %459 = vmatprep.mubr.msk.bf16.mxu1 %vm532_vm2, %v530_v0  ;;  %v57_v5 = vsel %vm55_vm1, %v56_v3, 0  ;;  %v490_v10 = vld [vmem:[%s685_s3 + $0x10] sm:$0xff]   ;;  %v491_v11 = vld [vmem:[%s685_s3 + $0x18] sm:$0xff]  }
   0x3   :  { %v488_v6 = vld [vmem:[%s685_s3] sm:$0xff]   ;;  %v59_v7 = vand.u32 %v487_v1, %v57_v5  ;;  %v35_v8 = vpack.c.bf16 %v34_v4, %v34_v4 }
   0x4   :  { %444 = vmatpush3.bf16.msra.mxu1 %v488_v6 }
   0x5   :  { %438 = vmatpush3.bf16.msra.mxu0 %v59_v7  ;;  %445 = vmatprep.subr.bf16.mxu1 %v530_v0 }
   0x6   :  { %463 = vmatprep.subr.bf16.mxu0 %v530_v0 }
   0x8   :  { %440 = vmatmul.mubr.msk.bf16.vlgmr.msra.gmra.mrb[0].mxu0 %vm50_vm3, %v35_v8  ;;  %446 = vmatpush3.bf16.msra.mxu1 %v489_v9 }
   0x9   :  { %447 = vmatprep.subr.bf16.mxu1 %v530_v0  ;;  %471 = vmatprep.mubr.msk.bf16.mxu0 %vm532_vm2, %v530_v0 }
   0xc   :  { %448 = vmatpush3.bf16.msra.mxu1 %v490_v10 }
   0xd   :  { %449 = vmatprep.subr.bf16.mxu1 %v530_v0 }
   0xe   :  { %14 = vsyncpa [#allocation3], 0  ;;  %v492_v12 = vld [vmem:[%s685_s3 + $0x20] sm:$0xff]   ;;  %v493_v13 = vld [vmem:[%s685_s3 + $0x28] sm:$0xff]   ;;  %vm255_vm4 = vcmask 523264   ;;  %vm324_vm5 = vcmask 261120  }
   0xf   :  { %v494_v14 = vld [vmem:[%s685_s3 + $0x30] sm:$0xff]   ;;  %v495_v15 = vld [vmem:[%s685_s3 + $0x38] sm:$0xff]   ;;  %v496_v16 = vld [vmem:[%s687_s5] sm:$0xff]   ;;  %vm368_vm6 = vcmask 64512  }
  0x10   :  { %450 = vmatpush3.bf16.msra.mxu1 %v491_v11  ;;  %464 = vmatpush3.bf16.msra.mxu0 %v496_v16  ;;  %v497_v17 = vld [vmem:[%s687_s5 + $0x8] sm:$0xff]   ;;  %v396_v18 = vld [vmem:[%s684_s2] ss:$0 sm:$0xff]  ;;  %v498_v26 = vld [vmem:[%s687_s5 + $0x10] sm:$0xff]  }
  0x11   :  { %451 = vmatprep.subr.bf16.mxu1 %v530_v0  ;;  %465 = vmatprep.subr.bf16.mxu0 %v530_v0  ;;  %v499_v27 = vld [vmem:[%s687_s5 + $0x18] sm:$0xff]   ;;  %v399_v28 = vld [vmem:[%s686_s4] ss:$0 sm:$0xff]  ;;  %v501_v37 = vld [vmem:[%s689_s7 + $0x8] sm:$0xff]  }
  0x12   :  { %v500_v35 = vld [vmem:[%s689_s7] sm:$0xff]  }
  0x13   :  { %v408_v38 = vld [vmem:[%s688_s6] ss:$0 sm:$0xff]  ;;  %s533_s6 = smov [#allocation2]  }
  0x14   :  { %452 = vmatpush3.bf16.msra.mxu1 %v492_v12  ;;  %466 = vmatpush3.bf16.msra.mxu0 %v497_v17  ;;  %v414_v46 = vld [vmem:[%s690_s8] ss:$0 sm:$0xff]  ;;  %s388_s7 = sshll.u32 %s533_s6, 4  ;;  %s389_s7 = int_to_ptr.vmem [resolvable:$true] %s388_s7 }
  0x15   :  { %453 = vmatprep.subr.bf16.mxu1 %v530_v0  ;;  %467 = vmatprep.subr.bf16.mxu0 %v530_v0  ;;  %s506_s8 = scalar_lea.vmem %s389_s7, 128  ;;  %p511_p1 = scmp.lt.s32.totalorder %s389_s7, %s389_s7 }
  0x16   :  { %p507_p0 = scmp.ne.s32.totalorder %s389_s7, %s506_s8  ;;  %p512_p2 = scmp.lt.s32.totalorder %s506_s8, %s506_s8 }
  0x18   :  { %454 = vmatpush3.bf16.msra.mxu1 %v493_v13  ;;  %468 = vmatpush3.bf16.msra.mxu0 %v498_v26  ;;  %p513_p3 = por %p512_p2, %p511_p1 }
  0x19   :  { %455 = vmatprep.subr.bf16.mxu1 %v530_v0  ;;  %469 = vmatprep.subr.bf16.mxu0 %v530_v0 }
  0x1a   :  { %p514_p4 = pnand %p513_p3, %p507_p0 }
  0x1c   :  { %456 = vmatpush3.bf16.msra.mxu1 %v494_v14  ;;  %470 = vmatpush3.bf16.msra.mxu0 %v499_v27 }
  0x1d   :  { %457 = vmatprep.subr.bf16.mxu1 %v530_v0  ;;  %475 = vmatprep.subr.bf16.mxu0 %v530_v0 }
  0x20   :  { %458 = vmatpush3.bf16.msra.mxu1 %v495_v15 }
  0xdb   :  { %v95_v19 = vpop.f32.mrb[0].mxu0 }
  0xdc   :  { %v96_v20 = vadd.f32 %v396_v18, %v95_v19  ;;  %v441_v21 = vpop.f32.mrb[1].mxu0 }
  0xdd   :  { %v98_v22 = vpop.f32.mrb[2].mxu0 }
  0xde   :  { %v101_v23 = vmax.f32 %v96_v20, 0.0  ;;  %v442_v24 = vpop.f32.mrb[3].mxu0 }
  0xe0   :  { %v102_v25 = vpack.c.bf16 %v101_v23, %v101_v23 }
  0xe2   :  { %460 = vmatmul.mubr.bf16.vlgmr.msra.gmra.mrb[0].mxu1 %v102_v25 }
 0x1b5   :  { %v208_v29 = vpop.f32.mrb[0].mxu1 }
 0x1b6   :  { %v209_v30 = vadd.f32 %v399_v28, %v208_v29  ;;  %v461_v31 = vpop.f32.mrb[1].mxu1 }
 0x1b7   :  { %v211_v32 = vpop.f32.mrb[2].mxu1 }
 0x1b8   :  { %v214_v33 = vmax.f32 %v209_v30, 0.0  ;;  %v462_v34 = vpop.f32.mrb[3].mxu1 }
 0x1ba   :  { %v215_v36 = vpack.c.bf16 %v214_v33, %v214_v33 }
 0x1bc   :  { %472 = vmatmul.mubr.msk.bf16.vlgmr.msra.gmra.mrb[4].mxu0 %vm255_vm4, %v215_v36 }
 0x1bd   :  { %476 = vmatpush3.bf16.msra.mxu0 %v500_v35  ;;  %479 = vmatprep.mubr.msk.bf16.mxu0 %vm532_vm2, %v530_v0 }
 0x1be   :  { %477 = vmatprep.subr.bf16.mxu0 %v530_v0 }
 0x1c1   :  { %478 = vmatpush3.bf16.msra.mxu0 %v501_v37 }
 0x28f   :  { %v293_v39 = vpop.f32.mrb[4].mxu0 }
 0x290   :  { %v294_v40 = vadd.f32 %v408_v38, %v293_v39  ;;  %v473_v41 = vpop.f32.mrb[5].mxu0 }
 0x291   :  { %v296_v42 = vpop.f32.mrb[6].mxu0 }
 0x292   :  { %v299_v43 = vmax.f32 %v294_v40, 0.0  ;;  %v474_v44 = vpop.f32.mrb[7].mxu0 }
 0x294   :  { %v300_v45 = vpack.c.bf16 %v299_v43, %v299_v43 }
 0x296   :  { %480 = vmatmul.mubr.msk.bf16.vlgmr.msra.gmra.mrb[8].mxu0 %vm324_vm5, %v300_v45 }
 0x369   :  { %v362_v47 = vpop.f32.mrb[8].mxu0 }
 0x36a   :  { %v363_v48 = vadd.f32 %v414_v46, %v362_v47  ;;  %v481_v49 = vpop.f32.mrb[9].mxu0 }
 0x36b   :  { %v365_v50 = vpop.f32.mrb[10].mxu0 }
 0x36c   :  { %v482_v51 = vpop.f32.mrb[11].mxu0  ;;  %v369_v52 = vsel %vm368_vm6, %v363_v48, -inf }
 0x36d   :  { %370 = vmax.xlane.f32.xlu0 %v369_v52 }
 0x3fa   :  { %v371_v53 = vpop.xlane.xlu0 %370 }
 0x3fb   :  { %v372_v54 = vsub.f32 %v363_v48, %v371_v53 }
 0x3fd   :  { %v373_v55 = vmul.f32 1.442695, %v372_v54 }
 0x3ff   :  { %502 = vpow2.f32 %v373_v55 }
 0x409   :  { %v503_v56 = vpop.eup %502 }
 0x40a   :  { %v375_v57 = vsel %vm368_vm6, %v503_v56, 0.0 }
 0x40b   :  { %376 = vadd.xlane.f32.xlu0 %v375_v57 }
 0x498   :  { %v377_v58 = vpop.xlane.xlu0 %376 }
 0x499   :  { %504 = vlog2.f32 %v377_v58 }
 0x4a3   :  { %v505_v59 = vpop.eup %504 }
 0x4a4   :  { %v379_v60 = vmul.f32 0.6931472, %v505_v59 }
 0x4a6   :  { %v380_v61 = vsub.f32 %v372_v54, %v379_v60 }
 0x4a8   :  { %381 = vst.msk [vmem:[#allocation2] sm:$0xff] %vm368_vm6, %v380_v61 }
 0x4a9   :  { %517 = shalt.err (!%p514_p4)
}
 0x4aa   :  { %s518_s22 = scalar_lea.hbm %s691_s9, 128 }
 0x4ab   :  { %p519_p5 = scmp.ne.s32.totalorder %s691_s9, %s518_s22  ;;  %p522_p6 = scmp.lt.u32.totalorder %s518_s22, %s691_s9 }
 0x4ad   :  { %p524_p7 = pnand %p522_p6, %p519_p5 }
 0x4af   :  { %527 = shalt.err (!%p524_p7)
}
 0x4b0   :  { %391 = dma.vmem_to_hbm [thread:$0]  %s389_s7, 128, %s691_s9, [#allocation3]  }
 0x4b1   :  { %528 = dma.done.wait [#allocation3], 128  }
 0x4b2   :  { %529 = vsyncadd [#allocation3], 4294967168 }
 0x4b3   :  { %395 = vsyncpa [#allocation3], 1 }

</bundles_post_ra>
